<compile_context>
chip_gen: v7x
topology: tpu7x:2x2x1
jax: 0.10.0
libtpu: 0.0.40
codegen_flags: <defaults>
</compile_context>

<pallas_src>
import functools

import numpy as np
import jax
import jax.numpy as jnp
from jax.experimental import pallas as pl
from jax.experimental.pallas import tpu as pltpu


# ---------------------------------------------------------------------------
# Fused Pallas kernel
# ---------------------------------------------------------------------------

def _encoder_layer_kernel(
        xp_ref,
        wh1_ref, bh1_ref, wl1_ref, bl1_ref,
        wh2_ref, bh2_ref, wl2_ref, bl2_ref,
        w1s_ref, w1h_ref, w1l_ref, w2t_ref,
        w3s_ref, w3h_ref, w3rh_ref, w3rl_ref,
        out_ref, attn_ref,
        *, batch, d_model, k_ma):
    """Whole EncoderLayer forward on a batch-packed (L, B*D) tile."""
    f32 = jnp.float32
    dot = lambda a, b: jnp.dot(a, b, preferred_element_type=f32)

    X = xp_ref[...]                                 # (L, B*D)  packed input
    L = X.shape[0]
    D = d_model
    pad = (k_ma - 1) // 2

    def moving_avg(z):
        """Edge-replicated AvgPool1d(k_ma, stride=1) along rows: banded sums."""
        C = z.shape[1]
        zp = jnp.concatenate(
            [jnp.broadcast_to(z[0:1, :], (pad, C)),
             z,
             jnp.broadcast_to(z[L - 1:L, :], (pad, C))], axis=0)   # (L+2*pad, C)
        acc = zp[0:L, :]
        for s in range(1, k_ma):
            acc = acc + zp[s:s + L, :]
        return acc * (1.0 / k_ma)

    # ---- wavelet_decomp 1 on x: one MXU op per filter covers all batches.
    x_h = jax.nn.sigmoid(dot(wh1_ref[...], X) + bh1_ref[...])      # (L, B*D)
    x_l = jax.nn.sigmoid(dot(wl1_ref[...], X) + bl1_ref[...])      # (L, B*D)

    # ---- self-attention (identity projections), fused in-kernel.
    scale = 1.0 / float(np.sqrt(D))
    newx_cols = []
    for b in range(batch):                          # static Python loop (small B)
        c0, c1 = b * D, (b + 1) * D
        xb = X[:, c0:c1]                            # (L, D)
        s = dot(xb, xb.T) * scale                   # (L, L)
        m = jnp.max(s, axis=-1, keepdims=True)
        p = jnp.exp(s - m)
        attn_b = p * pl.reciprocal(jnp.sum(p, axis=-1, keepdims=True), approx=True)
        attn_ref[b, :, :] = attn_b
        newx_cols.append(dot(attn_b, xb))
    new_X = newx_cols[0] if batch == 1 else jnp.concatenate(newx_cols, axis=-1)

    # ---- series_decomp 1 on x + dropout(new_x)   (dropout == identity)
    x_ts = X + new_X
    x_s = x_ts - moving_avg(x_ts)

    # ---- conv1 (1x1) + relu + conv2 (1x1): split weights, no concat of inputs.
    w1s, w1h, w1l, w2t = w1s_ref[...], w1h_ref[...], w1l_ref[...], w2t_ref[...]
    y_cols = []
    for b in range(batch):
        c0, c1 = b * D, (b + 1) * D
        z = jnp.maximum(dot(x_s[:, c0:c1], w1s)
                        + dot(x_h[:, c0:c1], w1h)
                        + dot(x_l[:, c0:c1], w1l), 0.0)            # (L, d_ff)
        y_cols.append(dot(z, w2t))                                 # (L, D)
    Y = y_cols[0] if batch == 1 else jnp.concatenate(y_cols, axis=-1)

    # ---- series_decomp 2 on (x_s + y)
    s2 = x_s + Y
    res_s = s2 - moving_avg(s2)

    # ---- wavelet_decomp 2 on (x_l + y): packed seq-dim matmuls again.
    hl = x_l + Y
    res_h = jax.nn.sigmoid(dot(wh2_ref[...], hl) + bh2_ref[...])
    res_l = jax.nn.sigmoid(dot(wl2_ref[...], hl) + bl2_ref[...])

    # ---- conv3 (1x1): split weights, no 4-way concat; single packed store.
    w3s, w3h, w3rh, w3rl = (w3s_ref[...], w3h_ref[...],
                            w3rh_ref[...], w3rl_ref[...])
    out_cols = []
    for b in range(batch):
        c0, c1 = b * D, (b + 1) * D
        out_cols.append(dot(res_s[:, c0:c1], w3s)
                        + dot(x_h[:, c0:c1], w3h)
                        + dot(res_h[:, c0:c1], w3rh)
                        + dot(res_l[:, c0:c1], w3rl))
    out_ref[...] = out_cols[0] if batch == 1 else jnp.concatenate(out_cols, axis=-1)


# ---------------------------------------------------------------------------
# Wrapper: layout plumbing + weight pre-transpose/pre-split, then one call.
# ---------------------------------------------------------------------------

@functools.partial(jax.jit, static_argnames=("k_ma",))
def encoder_layer_fwd(x, params, k_ma=5):
    B, L, D = x.shape

    # Batch packed into the lane axis:  xp[:, b*D+d] = x[b, :, d]
    xp = jnp.transpose(x, (1, 0, 2)).reshape(L, B * D)

    def bcast_bias(b):                      # hoist the (L,1)->(L,B*D) broadcast
        return jnp.broadcast_to(b, (L, B * D))

    # Pre-transpose / pre-split the 1x1-conv weights (no .T / concat in-kernel).
    w1t = params["w1"].T                    # (3D, d_ff)
    w2t = params["w2"].T                    # (d_ff, D)
    w3t = params["w3"].T                    # (4D, D)
    w1s, w1h, w1l = w1t[:D], w1t[D:2 * D], w1t[2 * D:]
    w3s, w3h, w3rh, w3rl = (w3t[:D], w3t[D:2 * D],
                            w3t[2 * D:3 * D], w3t[3 * D:])

    kernel = functools.partial(_encoder_layer_kernel,
                               batch=B, d_model=D, k_ma=k_ma)

    out_p, attn = pl.pallas_call(
        kernel,
        out_shape=(jax.ShapeDtypeStruct((L, B * D), jnp.float32),
                   jax.ShapeDtypeStruct((B, L, L), jnp.float32)),
        # No grid: one invocation covers the whole problem (no per-step
        # overhead, no double-buffering of the constant weights).
        compiler_params=pltpu.CompilerParams(vmem_limit_bytes=32 * 1024 * 1024),
    )(xp,
      params["wh1"], bcast_bias(params["bh1"]),
      params["wl1"], bcast_bias(params["bl1"]),
      params["wh2"], bcast_bias(params["bh2"]),
      params["wl2"], bcast_bias(params["bl2"]),
      w1s, w1h, w1l, w2t, w3s, w3h, w3rh, w3rl)

    out = jnp.transpose(out_p.reshape(L, B, D), (1, 0, 2))   # back to (B, L, D)
    return out, attn


# ---------------------------------------------------------------------------
# Pure-JAX reference (mirrors the PyTorch forward, eval mode)
# ---------------------------------------------------------------------------

def _reference_forward(x, params, k_ma):
    hi = jax.lax.Precision.HIGHEST
    B, L, D = x.shape
    pad = (k_ma - 1) // 2

    def mov_avg(z):
        zp = jnp.concatenate([jnp.repeat(z[:, :1], pad, axis=1), z,
                              jnp.repeat(z[:, -1:], pad, axis=1)], axis=1)
        return jnp.stack([jnp.mean(zp[:, t:t + k_ma], axis=1) for t in range(L)],
                         axis=1)

    s = jnp.einsum("bid,bjd->bij", x, x, precision=hi) / np.sqrt(D)
    attn = jax.nn.softmax(s, axis=-1)
    new_x = jnp.einsum("bij,bjd->bid", attn, x, precision=hi)

    x_ts = x + new_x
    x_s = x_ts - mov_avg(x_ts)
    x_h = jax.nn.sigmoid(jnp.einsum("ij,bjd->bid", params["wh1"], x, precision=hi)
                         + params["bh1"][None])
    x_l = jax.nn.sigmoid(jnp.einsum("ij,bjd->bid", params["wl1"], x, precision=hi)
                         + params["bl1"][None])
    y = jnp.concatenate([x_s, x_h, x_l], axis=-1)
    z = jax.nn.relu(jnp.einsum("blc,fc->blf", y, params["w1"], precision=hi))
    y = jnp.einsum("blf,df->bld", z, params["w2"], precision=hi)
    res_s = (x_s + y) - mov_avg(x_s + y)
    hl = x_l + y
    res_h = jax.nn.sigmoid(jnp.einsum("ij,bjd->bid", params["wh2"], hl, precision=hi)
                           + params["bh2"][None])
    res_l = jax.nn.sigmoid(jnp.einsum("ij,bjd->bid", params["wl2"], hl, precision=hi)
                           + params["bl2"][None])
    cat = jnp.concatenate([res_s, x_h, res_h, res_l], axis=-1)
    out = jnp.einsum("blc,dc->bld", cat, params["w3"], precision=hi)
    return out, attn


# ---------------------------------------------------------------------------
# Deterministic parameter construction (mirrors the PyTorch __init__)
# ---------------------------------------------------------------------------

_H_FILT = np.array([-0.0322, -0.0126, 0.0992, 0.2978,
                    -0.8037, 0.49761, 0.0296, -0.0757], np.float32)
_L_FILT = np.array([-0.0757, -0.0296, 0.4976, 0.8037,
                    0.2978, -0.0992, -0.0126, 0.0322], np.float32)


def create_W(P, is_l, key):
    filt = _L_FILT if is_l else _H_FILT
    max_eps = float(np.min(np.abs(filt)))
    w = np.asarray(jax.random.normal(key, (P, P), jnp.float32)) * 0.1 * max_eps
    w = np.array(w)
    for i in range(P):
        fi = 0
        for j in range(i - 4, P):
            if j < 0:
                fi += 1
            elif fi < len(filt):
                w[i, j] = filt[fi]
                fi += 1
    return jnp.asarray(w, jnp.float32)


def make_params(L, D, d_ff, key):
    ks = jax.random.split(key, 11)
    bound_L = 1.0 / np.sqrt(L)

    def bias(k):
        return jax.random.uniform(k, (L, 1), jnp.float32, -bound_L, bound_L)

    return {
        "wh1": create_W(L, False, ks[0]), "bh1": bias(ks[1]),
        "wl1": create_W(L, True, ks[2]),  "bl1": bias(ks[3]),
        "wh2": create_W(L, False, ks[4]), "bh2": bias(ks[5]),
        "wl2": create_W(L, True, ks[6]),  "bl2": bias(ks[7]),
        "w1": jax.random.normal(ks[8], (d_ff, 3 * D), jnp.float32) / np.sqrt(3 * D),
        "w2": jax.random.normal(ks[9], (D, d_ff), jnp.float32) / np.sqrt(d_ff),
        "w3": jax.random.normal(ks[10], (D, 4 * D), jnp.float32) / np.sqrt(4 * D),
    }


# ---------------------------------------------------------------------------

if __name__ == "__main__":
    B, L, D = 2, 16, 8          # batch, seq_len, d_model
    d_ff = 4 * D
    k_ma = 5                    # moving-average kernel size (odd)

    root = jax.random.PRNGKey(0)
    kx, kp = jax.random.split(root)
    x = jax.random.normal(kx, (B, L, D), jnp.float32)
    params = make_params(L, D, d_ff, kp)

    out, attn = encoder_layer_fwd(x, params, k_ma=k_ma)
    out = jax.block_until_ready(out)
    attn = jax.block_until_ready(attn)

    assert out.shape == (B, L, D) and attn.shape == (B, L, L)
    assert bool(jnp.all(jnp.isfinite(out))) and bool(jnp.all(jnp.isfinite(attn)))

    # Correctness vs. pure-JAX reference.  Loose tolerance covers the EUP
    # approximate reciprocal in the softmax and MXU rounding; a semantic bug
    # would show up as O(1) error.
    ref_out, ref_attn = _reference_forward(x, params, k_ma)
    np.testing.assert_allclose(np.asarray(out), np.asarray(ref_out),
                               rtol=5e-2, atol=5e-2)
    np.testing.assert_allclose(np.asarray(attn), np.asarray(ref_attn),
                               rtol=5e-2, atol=5e-2)

    print("KERNEL_OK")
</pallas_src>

<mosaic_0001>
module attributes {stable_mosaic.version = 11 : i64} {
  func.func @_encoder_layer_kernel(%arg0: memref<16x16xf32, #tpu.memory_space<vmem>>, %arg1: memref<16x16xf32, #tpu.memory_space<vmem>>, %arg2: memref<16x16xf32, #tpu.memory_space<vmem>>, %arg3: memref<16x16xf32, #tpu.memory_space<vmem>>, %arg4: memref<16x16xf32, #tpu.memory_space<vmem>>, %arg5: memref<16x16xf32, #tpu.memory_space<vmem>>, %arg6: memref<16x16xf32, #tpu.memory_space<vmem>>, %arg7: memref<16x16xf32, #tpu.memory_space<vmem>>, %arg8: memref<16x16xf32, #tpu.memory_space<vmem>>, %arg9: memref<8x32xf32, #tpu.memory_space<vmem>>, %arg10: memref<8x32xf32, #tpu.memory_space<vmem>>, %arg11: memref<8x32xf32, #tpu.memory_space<vmem>>, %arg12: memref<32x8xf32, #tpu.memory_space<vmem>>, %arg13: memref<8x8xf32, #tpu.memory_space<vmem>>, %arg14: memref<8x8xf32, #tpu.memory_space<vmem>>, %arg15: memref<8x8xf32, #tpu.memory_space<vmem>>, %arg16: memref<8x8xf32, #tpu.memory_space<vmem>>, %arg17: memref<16x16xf32, #tpu.memory_space<vmem>>, %arg18: memref<2x16x16xf32, #tpu.memory_space<vmem>>) attributes {dimension_semantics = [], scalar_prefetch = 0 : i64, scratch_operands = 0 : i64, tpu.core_type = #tpu.core_type<tc>} {
    %c0 = arith.constant 0 : index
    %c0_0 = arith.constant 0 : index
    %0 = vector.load %arg0[%c0, %c0_0] : memref<16x16xf32, #tpu.memory_space<vmem>>, vector<16x16xf32>
    %c0_1 = arith.constant 0 : index
    %c0_2 = arith.constant 0 : index
    %1 = vector.load %arg1[%c0_1, %c0_2] : memref<16x16xf32, #tpu.memory_space<vmem>>, vector<16x16xf32>
    %cst = arith.constant dense<0.000000e+00> : vector<16x16xf32>
    %2 = tpu.matmul %1, %0, %cst {dimension_numbers = #tpu.dot_dimension_numbers<[1], [0], [0], [1], [0, 0, 1, 1], [], []>} : vector<16x16xf32>, vector<16x16xf32>, vector<16x16xf32> -> vector<16x16xf32>
    %c0_3 = arith.constant 0 : index
    %c0_4 = arith.constant 0 : index
    %3 = vector.load %arg2[%c0_3, %c0_4] : memref<16x16xf32, #tpu.memory_space<vmem>>, vector<16x16xf32>
    %4 = arith.addf %2, %3 : vector<16x16xf32>
    %5 = arith.negf %4 : vector<16x16xf32>
    %6 = math.exp %5 : vector<16x16xf32>
    %cst_5 = arith.constant 1.000000e+00 : f32
    %7 = vector.broadcast %cst_5 : f32 to vector<16x16xf32>
    %8 = arith.addf %7, %6 : vector<16x16xf32>
    %9 = arith.divf %7, %8 : vector<16x16xf32>
    %c0_6 = arith.constant 0 : index
    %c0_7 = arith.constant 0 : index
    %10 = vector.load %arg3[%c0_6, %c0_7] : memref<16x16xf32, #tpu.memory_space<vmem>>, vector<16x16xf32>
    %cst_8 = arith.constant dense<0.000000e+00> : vector<16x16xf32>
    %11 = tpu.matmul %10, %0, %cst_8 {dimension_numbers = #tpu.dot_dimension_numbers<[1], [0], [0], [1], [0, 0, 1, 1], [], []>} : vector<16x16xf32>, vector<16x16xf32>, vector<16x16xf32> -> vector<16x16xf32>
    %c0_9 = arith.constant 0 : index
    %c0_10 = arith.constant 0 : index
    %12 = vector.load %arg4[%c0_9, %c0_10] : memref<16x16xf32, #tpu.memory_space<vmem>>, vector<16x16xf32>
    %13 = arith.addf %11, %12 : vector<16x16xf32>
    %14 = arith.negf %13 : vector<16x16xf32>
    %15 = math.exp %14 : vector<16x16xf32>
    %cst_11 = arith.constant 1.000000e+00 : f32
    %16 = vector.broadcast %cst_11 : f32 to vector<16x16xf32>
    %17 = arith.addf %16, %15 : vector<16x16xf32>
    %18 = arith.divf %16, %17 : vector<16x16xf32>
    %19 = vector.extract_strided_slice %0 {offsets = [0, 0], sizes = [16, 8], strides = [1, 1]} : vector<16x16xf32> to vector<16x8xf32>
    %20 = tpu.transpose %19, [1, 0] : vector<16x8xf32> -> vector<8x16xf32>
    %cst_12 = arith.constant dense<0.000000e+00> : vector<16x16xf32>
    %21 = tpu.matmul %19, %20, %cst_12 {dimension_numbers = #tpu.dot_dimension_numbers<[1], [0], [0], [1], [0, 0, 1, 1], [], []>} : vector<16x8xf32>, vector<8x16xf32>, vector<16x16xf32> -> vector<16x16xf32>
    %cst_13 = arith.constant 0.353553385 : f32
    %22 = vector.broadcast %cst_13 : f32 to vector<16x16xf32>
    %23 = arith.mulf %21, %22 : vector<16x16xf32>
    %cst_14 = arith.constant dense<0xFF800000> : vector<16xf32>
    %24 = vector.multi_reduction <maximumf>, %23, %cst_14 [1] : vector<16x16xf32> to vector<16xf32>
    %25 = vector.shape_cast %24 : vector<16xf32> to vector<16x1xf32>
    %26 = vector.broadcast %25 : vector<16x1xf32> to vector<16x16xf32>
    %27 = arith.subf %23, %26 : vector<16x16xf32>
    %28 = math.exp %27 : vector<16x16xf32>
    %cst_15 = arith.constant dense<0.000000e+00> : vector<16xf32>
    %29 = vector.multi_reduction <add>, %28, %cst_15 [1] : vector<16x16xf32> to vector<16xf32>
    %30 = vector.shape_cast %29 : vector<16xf32> to vector<16x1xf32>
    %31 = tpu.reciprocal %30 {approx = true} : vector<16x1xf32> -> vector<16x1xf32>
    %32 = vector.broadcast %31 : vector<16x1xf32> to vector<16x16xf32>
    %33 = arith.mulf %28, %32 : vector<16x16xf32>
    %c0_16 = arith.constant 0 : index
    %c0_17 = arith.constant 0 : index
    %c0_18 = arith.constant 0 : index
    %34 = vector.load %arg18[%c0_16, %c0_17, %c0_18] : memref<2x16x16xf32, #tpu.memory_space<vmem>>, vector<1x16x16xf32>
    %35 = vector.shape_cast %34 : vector<1x16x16xf32> to vector<16x16xf32>
    %36 = vector.shape_cast %33 : vector<16x16xf32> to vector<1x16x16xf32>
    tpu.vector_store %arg18[%c0_16, %c0_17, %c0_18], %36 {strides = array<i32>} : memref<2x16x16xf32, #tpu.memory_space<vmem>>, vector<1x16x16xf32>,
    %cst_19 = arith.constant dense<0.000000e+00> : vector<16x8xf32>
    %37 = tpu.matmul %33, %19, %cst_19 {dimension_numbers = #tpu.dot_dimension_numbers<[1], [0], [0], [1], [0, 0, 1, 1], [], []>} : vector<16x16xf32>, vector<16x8xf32>, vector<16x8xf32> -> vector<16x8xf32>
    %38 = vector.extract_strided_slice %0 {offsets = [0, 8], sizes = [16, 8], strides = [1, 1]} : vector<16x16xf32> to vector<16x8xf32>
    %39 = tpu.transpose %38, [1, 0] : vector<16x8xf32> -> vector<8x16xf32>
    %cst_20 = arith.constant dense<0.000000e+00> : vector<16x16xf32>
    %40 = tpu.matmul %38, %39, %cst_20 {dimension_numbers = #tpu.dot_dimension_numbers<[1], [0], [0], [1], [0, 0, 1, 1], [], []>} : vector<16x8xf32>, vector<8x16xf32>, vector<16x16xf32> -> vector<16x16xf32>
    %cst_21 = arith.constant 0.353553385 : f32
    %41 = vector.broadcast %cst_21 : f32 to vector<16x16xf32>
    %42 = arith.mulf %40, %41 : vector<16x16xf32>
    %cst_22 = arith.constant dense<0xFF800000> : vector<16xf32>
    %43 = vector.multi_reduction <maximumf>, %42, %cst_22 [1] : vector<16x16xf32> to vector<16xf32>
    %44 = vector.shape_cast %43 : vector<16xf32> to vector<16x1xf32>
    %45 = vector.broadcast %44 : vector<16x1xf32> to vector<16x16xf32>
    %46 = arith.subf %42, %45 : vector<16x16xf32>
    %47 = math.exp %46 : vector<16x16xf32>
    %cst_23 = arith.constant dense<0.000000e+00> : vector<16xf32>
    %48 = vector.multi_reduction <add>, %47, %cst_23 [1] : vector<16x16xf32> to vector<16xf32>
    %49 = vector.shape_cast %48 : vector<16xf32> to vector<16x1xf32>
    %50 = tpu.reciprocal %49 {approx = true} : vector<16x1xf32> -> vector<16x1xf32>
    %51 = vector.broadcast %50 : vector<16x1xf32> to vector<16x16xf32>
    %52 = arith.mulf %47, %51 : vector<16x16xf32>
    %c1 = arith.constant 1 : index
    %c0_24 = arith.constant 0 : index
    %c0_25 = arith.constant 0 : index
    %53 = vector.load %arg18[%c1, %c0_24, %c0_25] : memref<2x16x16xf32, #tpu.memory_space<vmem>>, vector<1x16x16xf32>
    %54 = vector.shape_cast %53 : vector<1x16x16xf32> to vector<16x16xf32>
    %55 = vector.shape_cast %52 : vector<16x16xf32> to vector<1x16x16xf32>
    tpu.vector_store %arg18[%c1, %c0_24, %c0_25], %55 {strides = array<i32>} : memref<2x16x16xf32, #tpu.memory_space<vmem>>, vector<1x16x16xf32>,
    %cst_26 = arith.constant dense<0.000000e+00> : vector<16x8xf32>
    %56 = tpu.matmul %52, %38, %cst_26 {dimension_numbers = #tpu.dot_dimension_numbers<[1], [0], [0], [1], [0, 0, 1, 1], [], []>} : vector<16x16xf32>, vector<16x8xf32>, vector<16x8xf32> -> vector<16x8xf32>
    %57 = tpu.concatenate %37, %56 in 1 : vector<16x8xf32>, vector<16x8xf32> -> vector<16x16xf32>
    %58 = arith.addf %0, %57 : vector<16x16xf32>
    %59 = vector.extract_strided_slice %58 {offsets = [0, 0], sizes = [1, 16], strides = [1, 1]} : vector<16x16xf32> to vector<1x16xf32>
    %60 = vector.shape_cast %59 : vector<1x16xf32> to vector<1x16xf32>
    %61 = vector.broadcast %60 : vector<1x16xf32> to vector<2x16xf32>
    %62 = vector.extract_strided_slice %58 {offsets = [15, 0], sizes = [1, 16], strides = [1, 1]} : vector<16x16xf32> to vector<1x16xf32>
    %63 = vector.shape_cast %62 : vector<1x16xf32> to vector<1x16xf32>
    %64 = vector.broadcast %63 : vector<1x16xf32> to vector<2x16xf32>
    %65 = tpu.concatenate %61, %58, %64 in 0 : vector<2x16xf32>, vector<16x16xf32>, vector<2x16xf32> -> vector<20x16xf32>
    %66 = vector.extract_strided_slice %65 {offsets = [0, 0], sizes = [16, 16], strides = [1, 1]} : vector<20x16xf32> to vector<16x16xf32>
    %67 = vector.extract_strided_slice %65 {offsets = [1, 0], sizes = [16, 16], strides = [1, 1]} : vector<20x16xf32> to vector<16x16xf32>
    %68 = arith.addf %66, %67 : vector<16x16xf32>
    %69 = vector.extract_strided_slice %65 {offsets = [2, 0], sizes = [16, 16], strides = [1, 1]} : vector<20x16xf32> to vector<16x16xf32>
    %70 = arith.addf %68, %69 : vector<16x16xf32>
    %71 = vector.extract_strided_slice %65 {offsets = [3, 0], sizes = [16, 16], strides = [1, 1]} : vector<20x16xf32> to vector<16x16xf32>
    %72 = arith.addf %70, %71 : vector<16x16xf32>
    %73 = vector.extract_strided_slice %65 {offsets = [4, 0], sizes = [16, 16], strides = [1, 1]} : vector<20x16xf32> to vector<16x16xf32>
    %74 = arith.addf %72, %73 : vector<16x16xf32>
    %cst_27 = arith.constant 2.000000e-01 : f32
    %75 = vector.broadcast %cst_27 : f32 to vector<16x16xf32>
    %76 = arith.mulf %74, %75 : vector<16x16xf32>
    %77 = arith.subf %58, %76 : vector<16x16xf32>
    %c0_28 = arith.constant 0 : index
    %c0_29 = arith.constant 0 : index
    %78 = vector.load %arg9[%c0_28, %c0_29] : memref<8x32xf32, #tpu.memory_space<vmem>>, vector<8x32xf32>
    %c0_30 = arith.constant 0 : index
    %c0_31 = arith.constant 0 : index
    %79 = vector.load %arg10[%c0_30, %c0_31] : memref<8x32xf32, #tpu.memory_space<vmem>>, vector<8x32xf32>
    %c0_32 = arith.constant 0 : index
    %c0_33 = arith.constant 0 : index
    %80 = vector.load %arg11[%c0_32, %c0_33] : memref<8x32xf32, #tpu.memory_space<vmem>>, vector<8x32xf32>
    %c0_34 = arith.constant 0 : index
    %c0_35 = arith.constant 0 : index
    %81 = vector.load %arg12[%c0_34, %c0_35] : memref<32x8xf32, #tpu.memory_space<vmem>>, vector<32x8xf32>
    %82 = vector.extract_strided_slice %77 {offsets = [0, 0], sizes = [16, 8], strides = [1, 1]} : vector<16x16xf32> to vector<16x8xf32>
    %cst_36 = arith.constant dense<0.000000e+00> : vector<16x32xf32>
    %83 = tpu.matmul %82, %78, %cst_36 {dimension_numbers = #tpu.dot_dimension_numbers<[1], [0], [0], [1], [0, 0, 1, 1], [], []>} : vector<16x8xf32>, vector<8x32xf32>, vector<16x32xf32> -> vector<16x32xf32>
    %84 = vector.extract_strided_slice %9 {offsets = [0, 0], sizes = [16, 8], strides = [1, 1]} : vector<16x16xf32> to vector<16x8xf32>
    %cst_37 = arith.constant dense<0.000000e+00> : vector<16x32xf32>
    %85 = tpu.matmul %84, %79, %cst_37 {dimension_numbers = #tpu.dot_dimension_numbers<[1], [0], [0], [1], [0, 0, 1, 1], [], []>} : vector<16x8xf32>, vector<8x32xf32>, vector<16x32xf32> -> vector<16x32xf32>
    %86 = arith.addf %83, %85 : vector<16x32xf32>
    %87 = vector.extract_strided_slice %18 {offsets = [0, 0], sizes = [16, 8], strides = [1, 1]} : vector<16x16xf32> to vector<16x8xf32>
    %cst_38 = arith.constant dense<0.000000e+00> : vector<16x32xf32>
    %88 = tpu.matmul %87, %80, %cst_38 {dimension_numbers = #tpu.dot_dimension_numbers<[1], [0], [0], [1], [0, 0, 1, 1], [], []>} : vector<16x8xf32>, vector<8x32xf32>, vector<16x32xf32> -> vector<16x32xf32>
    %89 = arith.addf %86, %88 : vector<16x32xf32>
    %cst_39 = arith.constant 0.000000e+00 : f32
    %90 = vector.broadcast %cst_39 : f32 to vector<16x32xf32>
    %91 = arith.maximumf %89, %90 : vector<16x32xf32>
    %cst_40 = arith.constant dense<0.000000e+00> : vector<16x8xf32>
    %92 = tpu.matmul %91, %81, %cst_40 {dimension_numbers = #tpu.dot_dimension_numbers<[1], [0], [0], [1], [0, 0, 1, 1], [], []>} : vector<16x32xf32>, vector<32x8xf32>, vector<16x8xf32> -> vector<16x8xf32>
    %93 = vector.extract_strided_slice %77 {offsets = [0, 8], sizes = [16, 8], strides = [1, 1]} : vector<16x16xf32> to vector<16x8xf32>
    %cst_41 = arith.constant dense<0.000000e+00> : vector<16x32xf32>
    %94 = tpu.matmul %93, %78, %cst_41 {dimension_numbers = #tpu.dot_dimension_numbers<[1], [0], [0], [1], [0, 0, 1, 1], [], []>} : vector<16x8xf32>, vector<8x32xf32>, vector<16x32xf32> -> vector<16x32xf32>
    %95 = vector.extract_strided_slice %9 {offsets = [0, 8], sizes = [16, 8], strides = [1, 1]} : vector<16x16xf32> to vector<16x8xf32>
    %cst_42 = arith.constant dense<0.000000e+00> : vector<16x32xf32>
    %96 = tpu.matmul %95, %79, %cst_42 {dimension_numbers = #tpu.dot_dimension_numbers<[1], [0], [0], [1], [0, 0, 1, 1], [], []>} : vector<16x8xf32>, vector<8x32xf32>, vector<16x32xf32> -> vector<16x32xf32>
    %97 = arith.addf %94, %96 : vector<16x32xf32>
    %98 = vector.extract_strided_slice %18 {offsets = [0, 8], sizes = [16, 8], strides = [1, 1]} : vector<16x16xf32> to vector<16x8xf32>
    %cst_43 = arith.constant dense<0.000000e+00> : vector<16x32xf32>
    %99 = tpu.matmul %98, %80, %cst_43 {dimension_numbers = #tpu.dot_dimension_numbers<[1], [0], [0], [1], [0, 0, 1, 1], [], []>} : vector<16x8xf32>, vector<8x32xf32>, vector<16x32xf32> -> vector<16x32xf32>
    %100 = arith.addf %97, %99 : vector<16x32xf32>
    %cst_44 = arith.constant 0.000000e+00 : f32
    %101 = vector.broadcast %cst_44 : f32 to vector<16x32xf32>
    %102 = arith.maximumf %100, %101 : vector<16x32xf32>
    %cst_45 = arith.constant dense<0.000000e+00> : vector<16x8xf32>
    %103 = tpu.matmul %102, %81, %cst_45 {dimension_numbers = #tpu.dot_dimension_numbers<[1], [0], [0], [1], [0, 0, 1, 1], [], []>} : vector<16x32xf32>, vector<32x8xf32>, vector<16x8xf32> -> vector<16x8xf32>
    %104 = tpu.concatenate %92, %103 in 1 : vector<16x8xf32>, vector<16x8xf32> -> vector<16x16xf32>
    %105 = arith.addf %77, %104 : vector<16x16xf32>
    %106 = vector.extract_strided_slice %105 {offsets = [0, 0], sizes = [1, 16], strides = [1, 1]} : vector<16x16xf32> to vector<1x16xf32>
    %107 = vector.shape_cast %106 : vector<1x16xf32> to vector<1x16xf32>
    %108 = vector.broadcast %107 : vector<1x16xf32> to vector<2x16xf32>
    %109 = vector.extract_strided_slice %105 {offsets = [15, 0], sizes = [1, 16], strides = [1, 1]} : vector<16x16xf32> to vector<1x16xf32>
    %110 = vector.shape_cast %109 : vector<1x16xf32> to vector<1x16xf32>
    %111 = vector.broadcast %110 : vector<1x16xf32> to vector<2x16xf32>
    %112 = tpu.concatenate %108, %105, %111 in 0 : vector<2x16xf32>, vector<16x16xf32>, vector<2x16xf32> -> vector<20x16xf32>
    %113 = vector.extract_strided_slice %112 {offsets = [0, 0], sizes = [16, 16], strides = [1, 1]} : vector<20x16xf32> to vector<16x16xf32>
    %114 = vector.extract_strided_slice %112 {offsets = [1, 0], sizes = [16, 16], strides = [1, 1]} : vector<20x16xf32> to vector<16x16xf32>
    %115 = arith.addf %113, %114 : vector<16x16xf32>
    %116 = vector.extract_strided_slice %112 {offsets = [2, 0], sizes = [16, 16], strides = [1, 1]} : vector<20x16xf32> to vector<16x16xf32>
    %117 = arith.addf %115, %116 : vector<16x16xf32>
    %118 = vector.extract_strided_slice %112 {offsets = [3, 0], sizes = [16, 16], strides = [1, 1]} : vector<20x16xf32> to vector<16x16xf32>
    %119 = arith.addf %117, %118 : vector<16x16xf32>
    %120 = vector.extract_strided_slice %112 {offsets = [4, 0], sizes = [16, 16], strides = [1, 1]} : vector<20x16xf32> to vector<16x16xf32>
    %121 = arith.addf %119, %120 : vector<16x16xf32>
    %cst_46 = arith.constant 2.000000e-01 : f32
    %122 = vector.broadcast %cst_46 : f32 to vector<16x16xf32>
    %123 = arith.mulf %121, %122 : vector<16x16xf32>
    %124 = arith.subf %105, %123 : vector<16x16xf32>
    %125 = arith.addf %18, %104 : vector<16x16xf32>
    %c0_47 = arith.constant 0 : index
    %c0_48 = arith.constant 0 : index
    %126 = vector.load %arg5[%c0_47, %c0_48] : memref<16x16xf32, #tpu.memory_space<vmem>>, vector<16x16xf32>
    %cst_49 = arith.constant dense<0.000000e+00> : vector<16x16xf32>
    %127 = tpu.matmul %126, %125, %cst_49 {dimension_numbers = #tpu.dot_dimension_numbers<[1], [0], [0], [1], [0, 0, 1, 1], [], []>} : vector<16x16xf32>, vector<16x16xf32>, vector<16x16xf32> -> vector<16x16xf32>
    %c0_50 = arith.constant 0 : index
    %c0_51 = arith.constant 0 : index
    %128 = vector.load %arg6[%c0_50, %c0_51] : memref<16x16xf32, #tpu.memory_space<vmem>>, vector<16x16xf32>
    %129 = arith.addf %127, %128 : vector<16x16xf32>
    %130 = arith.negf %129 : vector<16x16xf32>
    %131 = math.exp %130 : vector<16x16xf32>
    %cst_52 = arith.constant 1.000000e+00 : f32
    %132 = vector.broadcast %cst_52 : f32 to vector<16x16xf32>
    %133 = arith.addf %132, %131 : vector<16x16xf32>
    %134 = arith.divf %132, %133 : vector<16x16xf32>
    %c0_53 = arith.constant 0 : index
    %c0_54 = arith.constant 0 : index
    %135 = vector.load %arg7[%c0_53, %c0_54] : memref<16x16xf32, #tpu.memory_space<vmem>>, vector<16x16xf32>
    %cst_55 = arith.constant dense<0.000000e+00> : vector<16x16xf32>
    %136 = tpu.matmul %135, %125, %cst_55 {dimension_numbers = #tpu.dot_dimension_numbers<[1], [0], [0], [1], [0, 0, 1, 1], [], []>} : vector<16x16xf32>, vector<16x16xf32>, vector<16x16xf32> -> vector<16x16xf32>
    %c0_56 = arith.constant 0 : index
    %c0_57 = arith.constant 0 : index
    %137 = vector.load %arg8[%c0_56, %c0_57] : memref<16x16xf32, #tpu.memory_space<vmem>>, vector<16x16xf32>
    %138 = arith.addf %136, %137 : vector<16x16xf32>
    %139 = arith.negf %138 : vector<16x16xf32>
    %140 = math.exp %139 : vector<16x16xf32>
    %cst_58 = arith.constant 1.000000e+00 : f32
    %141 = vector.broadcast %cst_58 : f32 to vector<16x16xf32>
    %142 = arith.addf %141, %140 : vector<16x16xf32>
    %143 = arith.divf %141, %142 : vector<16x16xf32>
    %c0_59 = arith.constant 0 : index
    %c0_60 = arith.constant 0 : index
    %144 = vector.load %arg13[%c0_59, %c0_60] : memref<8x8xf32, #tpu.memory_space<vmem>>, vector<8x8xf32>
    %c0_61 = arith.constant 0 : index
    %c0_62 = arith.constant 0 : index
    %145 = vector.load %arg14[%c0_61, %c0_62] : memref<8x8xf32, #tpu.memory_space<vmem>>, vector<8x8xf32>
    %c0_63 = arith.constant 0 : index
    %c0_64 = arith.constant 0 : index
    %146 = vector.load %arg15[%c0_63, %c0_64] : memref<8x8xf32, #tpu.memory_space<vmem>>, vector<8x8xf32>
    %c0_65 = arith.constant 0 : index
    %c0_66 = arith.constant 0 : index
    %147 = vector.load %arg16[%c0_65, %c0_66] : memref<8x8xf32, #tpu.memory_space<vmem>>, vector<8x8xf32>
    %148 = vector.extract_strided_slice %124 {offsets = [0, 0], sizes = [16, 8], strides = [1, 1]} : vector<16x16xf32> to vector<16x8xf32>
    %cst_67 = arith.constant dense<0.000000e+00> : vector<16x8xf32>
    %149 = tpu.matmul %148, %144, %cst_67 {dimension_numbers = #tpu.dot_dimension_numbers<[1], [0], [0], [1], [0, 0, 1, 1], [], []>} : vector<16x8xf32>, vector<8x8xf32>, vector<16x8xf32> -> vector<16x8xf32>
    %150 = vector.extract_strided_slice %9 {offsets = [0, 0], sizes = [16, 8], strides = [1, 1]} : vector<16x16xf32> to vector<16x8xf32>
    %cst_68 = arith.constant dense<0.000000e+00> : vector<16x8xf32>
    %151 = tpu.matmul %150, %145, %cst_68 {dimension_numbers = #tpu.dot_dimension_numbers<[1], [0], [0], [1], [0, 0, 1, 1], [], []>} : vector<16x8xf32>, vector<8x8xf32>, vector<16x8xf32> -> vector<16x8xf32>
    %152 = arith.addf %149, %151 : vector<16x8xf32>
    %153 = vector.extract_strided_slice %134 {offsets = [0, 0], sizes = [16, 8], strides = [1, 1]} : vector<16x16xf32> to vector<16x8xf32>
    %cst_69 = arith.constant dense<0.000000e+00> : vector<16x8xf32>
    %154 = tpu.matmul %153, %146, %cst_69 {dimension_numbers = #tpu.dot_dimension_numbers<[1], [0], [0], [1], [0, 0, 1, 1], [], []>} : vector<16x8xf32>, vector<8x8xf32>, vector<16x8xf32> -> vector<16x8xf32>
    %155 = arith.addf %152, %154 : vector<16x8xf32>
    %156 = vector.extract_strided_slice %143 {offsets = [0, 0], sizes = [16, 8], strides = [1, 1]} : vector<16x16xf32> to vector<16x8xf32>
    %cst_70 = arith.constant dense<0.000000e+00> : vector<16x8xf32>
    %157 = tpu.matmul %156, %147, %cst_70 {dimension_numbers = #tpu.dot_dimension_numbers<[1], [0], [0], [1], [0, 0, 1, 1], [], []>} : vector<16x8xf32>, vector<8x8xf32>, vector<16x8xf32> -> vector<16x8xf32>
    %158 = arith.addf %155, %157 : vector<16x8xf32>
    %159 = vector.extract_strided_slice %124 {offsets = [0, 8], sizes = [16, 8], strides = [1, 1]} : vector<16x16xf32> to vector<16x8xf32>
    %cst_71 = arith.constant dense<0.000000e+00> : vector<16x8xf32>
    %160 = tpu.matmul %159, %144, %cst_71 {dimension_numbers = #tpu.dot_dimension_numbers<[1], [0], [0], [1], [0, 0, 1, 1], [], []>} : vector<16x8xf32>, vector<8x8xf32>, vector<16x8xf32> -> vector<16x8xf32>
    %161 = vector.extract_strided_slice %9 {offsets = [0, 8], sizes = [16, 8], strides = [1, 1]} : vector<16x16xf32> to vector<16x8xf32>
    %cst_72 = arith.constant dense<0.000000e+00> : vector<16x8xf32>
    %162 = tpu.matmul %161, %145, %cst_72 {dimension_numbers = #tpu.dot_dimension_numbers<[1], [0], [0], [1], [0, 0, 1, 1], [], []>} : vector<16x8xf32>, vector<8x8xf32>, vector<16x8xf32> -> vector<16x8xf32>
    %163 = arith.addf %160, %162 : vector<16x8xf32>
    %164 = vector.extract_strided_slice %134 {offsets = [0, 8], sizes = [16, 8], strides = [1, 1]} : vector<16x16xf32> to vector<16x8xf32>
    %cst_73 = arith.constant dense<0.000000e+00> : vector<16x8xf32>
    %165 = tpu.matmul %164, %146, %cst_73 {dimension_numbers = #tpu.dot_dimension_numbers<[1], [0], [0], [1], [0, 0, 1, 1], [], []>} : vector<16x8xf32>, vector<8x8xf32>, vector<16x8xf32> -> vector<16x8xf32>
    %166 = arith.addf %163, %165 : vector<16x8xf32>
    %167 = vector.extract_strided_slice %143 {offsets = [0, 8], sizes = [16, 8], strides = [1, 1]} : vector<16x16xf32> to vector<16x8xf32>
    %cst_74 = arith.constant dense<0.000000e+00> : vector<16x8xf32>
    %168 = tpu.matmul %167, %147, %cst_74 {dimension_numbers = #tpu.dot_dimension_numbers<[1], [0], [0], [1], [0, 0, 1, 1], [], []>} : vector<16x8xf32>, vector<8x8xf32>, vector<16x8xf32> -> vector<16x8xf32>
    %169 = arith.addf %166, %168 : vector<16x8xf32>
    %170 = tpu.concatenate %158, %169 in 1 : vector<16x8xf32>, vector<16x8xf32> -> vector<16x16xf32>
    %c0_75 = arith.constant 0 : index
    %c0_76 = arith.constant 0 : index
    %171 = vector.load %arg17[%c0_75, %c0_76] : memref<16x16xf32, #tpu.memory_space<vmem>>, vector<16x16xf32>
    tpu.vector_store %arg17[%c0_75, %c0_76], %170 {strides = array<i32>} : memref<16x16xf32, #tpu.memory_space<vmem>>, vector<16x16xf32>,
    return
  }
}

</mosaic_0001>

<bundles_post_ra>
// kernel: encoder_layer_fwd.1
= control target key start
LH: loop header
LB: loop body
LE: loop exit
PB: predicated region body
PF: predicated region fallthrough
CT: control target
= control target key end

     0   :  { %s3213_s0 = inlined_call_operand.vmem [shape: f32[16,16], index: 0, kind: input, shape index: {}]   ;;  %s3214_s1 = inlined_call_operand.vmem [shape: f32[16,16], index: 1, kind: input, shape index: {}]   ;;  %s3215_s2 = inlined_call_operand.vmem [shape: f32[16,16], index: 2, kind: input, shape index: {}]   ;;  %s3216_s3 = inlined_call_operand.vmem [shape: f32[16,16], index: 3, kind: input, shape index: {}]   ;;  %s3217_s4 = inlined_call_operand.vmem [shape: f32[16,16], index: 4, kind: input, shape index: {}]   ;;  %s3218_s5 = inlined_call_operand.vmem [shape: f32[16,16], index: 5, kind: input, shape index: {}]   ;;  %s3219_s6 = inlined_call_operand.vmem [shape: f32[16,16], index: 6, kind: input, shape index: {}]   ;;  %s3220_s7 = inlined_call_operand.vmem [shape: f32[16,16], index: 7, kind: input, shape index: {}]   ;;  %s3221_s8 = inlined_call_operand.vmem [shape: f32[16,16], index: 8, kind: input, shape index: {}]   ;;  %s3222_s9 = inlined_call_operand.vmem [shape: f32[8,32], index: 9, kind: input, shape index: {}]   ;;  %s3223_s10 = inlined_call_operand.vmem [shape: f32[8,32], index: 10, kind: input, shape index: {}]   ;;  %s3224_s11 = inlined_call_operand.vmem [shape: f32[8,32], index: 11, kind: input, shape index: {}]   ;;  %s3225_s12 = inlined_call_operand.vmem [shape: f32[32,8], index: 12, kind: input, shape index: {}]   ;;  %s3226_s13 = inlined_call_operand.vmem [shape: f32[8,8], index: 13, kind: input, shape index: {}]   ;;  %s3227_s14 = inlined_call_operand.vmem [shape: f32[8,8], index: 14, kind: input, shape index: {}]   ;;  %s3228_s15 = inlined_call_operand.vmem [shape: f32[8,8], index: 15, kind: input, shape index: {}]   ;;  %s3229_s16 = inlined_call_operand.vmem [shape: f32[8,8], index: 16, kind: input, shape index: {}]   ;;  %s3230_s17 = inlined_call_operand.vmem [shape: f32[16,16], index: 17, kind: output, shape index: {0}]   ;;  %s3231_s18 = inlined_call_operand.hbm [shape: f32[2,16,16], index: 18, kind: output, shape index: {1}]  }
   0x1   :  { %3235 = sst [smem:[#allocation5_spill]] %s3213_s0 }
   0x2   :  { %3236 = sst [smem:[#allocation6_spill]] %s3214_s1 }
   0x3   :  { %3237 = sst [smem:[#allocation7_spill]] %s3215_s2 }
   0x4   :  { %s3238_s29 = sld [smem:[#allocation5_spill]]  ;;  %s3239_s20 = sld [smem:[#allocation6_spill]]  ;;  %vm65_vm0 = vcmask 130048   ;;  %vm256_vm1 = vcmask 64512  }
   0x5   :  { %vm2898_vm2 = vmpackc.low %vm256_vm1, %vm256_vm1 }
   0xa   :  { %v2883_v0 = vld [vmem:[%s3238_s29] sm:$0xff]  ;;  %v2888_v1 = vld [vmem:[%s3238_s29 + $0x8] sm:$0xff] }
   0xb   :  { %v61_v2 = vld [vmem:[%s3239_s20] sm:$0xff]  ;;  %v2633_v3 = vpack.c.bf16 %v2888_v1, %v2883_v0 }
   0xc   :  { %2489 = vmatprep.mubr.msk.f32.mxu0 %vm65_vm0, %v61_v2 }
   0xd   :  { %24 = vsyncpa [#allocation3], 0  ;;  %2634 = vmatprep.subr.bf16.mxu0 %v2633_v3  ;;  %2638 = vmatprep.subr.bf16.mxu1 %v2633_v3  ;;  %v62_v5 = vld [vmem:[%s3239_s20 + $0x8] sm:$0xff]  ;;  %s2781_s2 = smov 120   ;;  %v159_v24 = vld [vmem:[%s3216_s3] sm:$0xff]  ;;  %s3242_s30 = sld [smem:[#allocation7_spill]] }
   0xe   :  { %2636 = vmatpush3.bf16.msra.mxu0 %v2633_v3  ;;  %2640 = vmatpush3.bf16.msra.mxu1 %v2633_v3  ;;  %v160_v25 = vld [vmem:[%s3216_s3 + $0x8] sm:$0xff]  ;;  %v2959_v55 = vld [vmem:[%s3223_s10] sm:$0xff]  ;;  %s2782_s20 = smov 8   ;;  %vm660_vm3 = vcmask 1041408   ;;  %vm671_vm4 = vcmask 1046528   ;;  %vm681_vm5 = vcmask 1045504  }
   0xf   :  { %2643 = vmatprep.subr.msk.bf16.mxu0 %vm2898_vm2, %v2633_v3  ;;  %2648 = vmatprep.subr.bf16.mxu1 %v2633_v3  ;;  %vm691_vm6 = vcmask 1044480   ;;  %vm701_vm7 = vcmask 1043456   ;;  %vm969_vm8 = vcmask 261120  }
  0x10   :  { %2496 = vmatprep.mubr.msk.f32.mxu1 %vm65_vm0, %v159_v24 }
  0x11   :  { %2490 = vmatmul.mubr.msk.f32.vlgmr.msra.gmra.mrb[0].mxu0 %vm65_vm0, %v62_v5  ;;  %2497 = vmatmul.mubr.msk.f32.vlgmr.msra.gmra.mrb[0].mxu1 %vm65_vm0, %v160_v25 }
  0x12   :  { %2503 = vmatprep.mubr.msk.f32.mxu0 %vm256_vm1, %v2883_v0  ;;  %2650 = vmatpush3.bf16.msra.mxu1 %v2633_v3 }
  0x13   :  { %v63_v56 = vld [vmem:[%s3242_s30] sm:$0xff]  ;;  %v64_v57 = vld [vmem:[%s3242_s30 + $0x8] sm:$0xff] }
  0x17   :  { %2646 = vmatpush3.bf16.xpose.msk.msra.mxu0 %vm2898_vm2, %v2633_v3 }
  0x1e   :  { %2504 = vmatmul.mubr.msk.f32.vlgmr.msra.gmra.mrb[2].mxu0 %vm256_vm1, %v2888_v1 }
  0xe4   :  { %v2914_v6 = vpop.f32.mrb[0].mxu0  ;;  %v2944_v35 = vpop.f32.mrb[0].mxu1 }
  0xe5   :  { %v2916_v7 = vpop.f32.mrb[1].mxu0  ;;  %v2946_v36 = vpop.f32.mrb[1].mxu1  ;;  %v144_v59 = vadd.f32 %v2914_v6, %v64_v57 }
  0xe6   :  { %v139_v58 = vadd.f32 %v2916_v7, %v63_v56 }
  0xe7   :  { %v2342_v61 = vmul.f32 -1.442695, %v144_v59 }
  0xe8   :  { %v2341_v60 = vmul.f32 -1.442695, %v139_v58 }
  0xf1   :  { %v2505_v8 = vpop.f32.mrb[2].mxu0 }
  0xf2   :  { %v329_v9 = vpop.f32.mrb[3].mxu0  ;;  %v339_v11 = vmul.f32 0.35355338, %v2505_v8 }
  0xf3   :  { %v338_v10 = vmul.f32 0.35355338, %v329_v9 }
  0xf4   :  { %v343_v13 = vsel %vm65_vm0, %v339_v11, -inf }
  0xf5   :  { %v340_v12 = vsel %vm65_vm0, %v338_v10, -inf }
  0xf6   :  { %341 = vmax.xlane.f32.xlu0 %v340_v12  ;;  %v2986_v12 = vld [vmem:[%s3222_s9] sm:$0xff] }
  0xfa   :  { %344 = vmax.xlane.f32.xlu0 %v343_v13 }
 0x110   :  { %445 = vrot.lane.b32.xlu0 %v2883_v0, %s2781_s2 }
 0x183   :  { %v342_v14 = vpop.xlane.xlu0 %341 }
 0x184   :  { %v346_v15 = vsub.f32 %v338_v10, %v342_v14 }
 0x186   :  { %v348_v18 = vmul.f32 1.442695, %v346_v15  ;;  %v2999_v15 = vld [vmem:[%s3224_s11] sm:$0xff] }
 0x187   :  { %v345_v16 = vpop.xlane.xlu0 %344 }
 0x188   :  { %v347_v17 = vsub.f32 %v339_v11, %v345_v16  ;;  %v161_v16 = vld [vmem:[%s3217_s4] sm:$0xff] }
 0x18a   :  { %v350_v19 = vmul.f32 1.442695, %v347_v17  ;;  %v236_v17 = vadd.f32 %v2946_v36, %v161_v16 }
 0x18b   :  { %v446_v28 = vpop.permute.xlu0 %445 }
 0x18c   :  { %2709 = vpow2.f32 %v350_v19  ;;  %v2345_v19 = vmul.f32 -1.442695, %v236_v17 }
 0x18d   :  { %2711 = vpow2.f32 %v348_v18  ;;  %v162_v18 = vld [vmem:[%s3217_s4 + $0x8] sm:$0xff] }
 0x196   :  { %v2710_v20 = vpop.eup %2709 }
 0x197   :  { %v355_v21 = vsel %vm65_vm0, %v2710_v20, 0.0  ;;  %v2712_v22 = vpop.eup %2711 }
 0x198   :  { %356 = vadd.xlane.f32.xlu1 %v355_v21  ;;  %v352_v23 = vsel %vm65_vm0, %v2712_v22, 0.0  ;;  %v650_v21 = vlaneseq }
 0x19c   :  { %353 = vadd.xlane.f32.xlu1 %v352_v23  ;;  %v3010_v23 = vshrl.u32 %v650_v21, 7  ;;  %v720_v21 = vld [vmem:[%s3225_s12 + $0x10] sm:$0xff] }
 0x19e   :  { %v656_v24 = vsub.s32 7, %v3010_v23 }
 0x1ad   :  { %447 = vrot.lane.b32.xlu1 %v2888_v1, %s2781_s2 }
 0x225   :  { %v357_v26 = vpop.xlane.xlu1 %356 }
 0x226   :  { %2713 = vrcp.f32 %v357_v26 }
 0x229   :  { %v354_v27 = vpop.xlane.xlu1 %353 }
 0x22a   :  { %2715 = vrcp.f32 %v354_v27  ;;  %v652_v27 = vsub.s32 0, %v3010_v23  ;;  %v1460_v23 = vld [vmem:[%s3218_s5 + $0x8] sm:$0xff] }
 0x22d   :  { %v448_v29 = vpop.permute.xlu1 %447 }
 0x22e   :  { %v2651_v30 = vpack.c.bf16 %v448_v29, %v446_v28 }
 0x230   :  { %v2714_v31 = vpop.eup %2713  ;;  %2658 = vmatprep.subr.bf16.mxu0 %v2651_v30  ;;  %2653 = vmatprep.subr.msk.bf16.mxu1 %vm2898_vm2, %v2651_v30 }
 0x231   :  { %v361_v32 = vmul.f32 %v2714_v31, %v2710_v20  ;;  %2660 = vmatpush3.bf16.msra.mxu0 %v2651_v30  ;;  %v241_v20 = vadd.f32 %v2944_v35, %v162_v18 }
 0x232   :  { %2527 = vmatprep.subr.mxu0 %v2959_v55 }
 0x233   :  { %363 = vst.msk [vmem:[#allocation2 + $0x8] sm:$0xff] %vm65_vm0, %v361_v32 }
 0x234   :  { %v2716_v33 = vpop.eup %2715 }
 0x235   :  { %v360_v34 = vmul.f32 %v2716_v33, %v2712_v22  ;;  %v2346_v22 = vmul.f32 -1.442695, %v241_v20 }
 0x237   :  { %362 = vst.msk [vmem:[#allocation2] sm:$0xff] %vm65_vm0, %v360_v34  ;;  %2510 = vmatprep.mubr.msk.f32.mxu1 %vm65_vm0, %v360_v34 }
 0x238   :  { %2511 = vmatmul.mubr.msk.f32.vlgmr.msra.gmra.mrb[2].mxu1 %vm65_vm0, %v361_v32 }
 0x239   :  { %2656 = vmatpush3.bf16.xpose.msk.msra.mxu1 %vm2898_vm2, %v2651_v30  ;;  %2517 = vmatprep.mubr.msk.f32.mxu1 %vm256_vm1, %v446_v28 }
 0x240   :  { %2518 = vmatmul.mubr.msk.f32.vlgmr.msra.gmra.mrb[4].mxu1 %vm256_vm1, %v448_v29 }
 0x30b   :  { %v2948_v37 = vpop.f32.mrb[2].mxu1 }
 0x30c   :  { %v2950_v38 = vpop.f32.mrb[3].mxu1 }
 0x313   :  { %v2519_v39 = vpop.f32.mrb[4].mxu1 }
 0x314   :  { %v529_v40 = vmul.f32 0.35355338, %v2519_v39  ;;  %v519_v41 = vpop.f32.mrb[5].mxu1 }
 0x315   :  { %v528_v42 = vmul.f32 0.35355338, %v519_v41 }
 0x316   :  { %v533_v43 = vsel %vm65_vm0, %v529_v40, -inf }
 0x317   :  { %534 = vmax.xlane.f32.xlu0 %v533_v43  ;;  %v530_v44 = vsel %vm65_vm0, %v528_v42, -inf }
 0x318   :  { %531 = vmax.xlane.f32.xlu1 %v530_v44 }
 0x3a4   :  { %v535_v45 = vpop.xlane.xlu0 %534 }
 0x3a5   :  { %v537_v46 = vsub.f32 %v529_v40, %v535_v45  ;;  %v532_v47 = vpop.xlane.xlu1 %531 }
 0x3a6   :  { %v536_v48 = vsub.f32 %v528_v42, %v532_v47 }
 0x3a7   :  { %v540_v49 = vmul.f32 1.442695, %v537_v46 }
 0x3a8   :  { %v538_v50 = vmul.f32 1.442695, %v536_v48 }
 0x3a9   :  { %2717 = vpow2.f32 %v540_v49 }
 0x3aa   :  { %2719 = vpow2.f32 %v538_v50 }
 0x3ab   :  { %2721 = vpow2.f32 %v2341_v60 }
 0x3ac   :  { %2723 = vpow2.f32 %v2342_v61 }
 0x3b3   :  { %v2718_v51 = vpop.eup %2717 }
 0x3b4   :  { %v2720_v52 = vpop.eup %2719  ;;  %v545_v53 = vsel %vm65_vm0, %v2718_v51, 0.0 }
 0x3b5   :  { %546 = vadd.xlane.f32.xlu1 %v545_v53  ;;  %v542_v54 = vsel %vm65_vm0, %v2720_v52, 0.0  ;;  %v2722_v62 = vpop.eup %2721 }
 0x3b6   :  { %543 = vadd.xlane.f32.xlu0 %v542_v54  ;;  %v2724_v3 = vpop.eup %2723  ;;  %v153_v4 = vadd.f32 1.0, %v2722_v62 }
 0x3b7   :  { %v154_v5 = vadd.f32 1.0, %v2724_v3  ;;  %v719_v3 = vld [vmem:[%s3225_s12 + $0x8] sm:$0xff] }
 0x442   :  { %v547_v63 = vpop.xlane.xlu1 %546 }
 0x443   :  { %2725 = vrcp.f32 %v547_v63  ;;  %v544_v2 = vpop.xlane.xlu0 %543 }
 0x444   :  { %2727 = vrcp.f32 %v544_v2  ;;  %v718_v2 = vld [vmem:[%s3225_s12] sm:$0xff] }
 0x445   :  { %2729 = vrcp.f32 %v153_v4 }
 0x446   :  { %2731 = vrcp.f32 %v154_v5 }
 0x447   :  { %2733 = vpow2.f32 %v2345_v19 }
 0x448   :  { %2735 = vpow2.f32 %v2346_v22  ;;  %v721_v22 = vld [vmem:[%s3225_s12 + $0x18] sm:$0xff] }
 0x44d   :  { %v2726_v8 = vpop.eup %2725 }
 0x44e   :  { %v2728_v9 = vpop.eup %2727  ;;  %v551_v10 = vmul.f32 %v2726_v8, %v2718_v51  ;;  %v2661_v8 = vpack.c.bf16 %v719_v3, %v718_v2 }
 0x44f   :  { %v550_v7 = vmul.f32 %v2728_v9, %v2720_v52  ;;  %v2973_v6 = vpop.eup %2729 }
 0x450   :  { %554 = vst.msk [vmem:[#allocation2 + $0x18] sm:$0xff] %vm65_vm0, %v551_v10  ;;  %v2979_v11 = vpop.eup %2731  ;;  %2662 = vmatprep.subr.bf16.mxu1 %v2661_v8 }
 0x451   :  { %553 = vst.msk [vmem:[#allocation2 + $0x10] sm:$0xff] %vm65_vm0, %v550_v7  ;;  %2524 = vmatprep.mubr.msk.f32.mxu0 %vm65_vm0, %v550_v7  ;;  %v2734_v29 = vpop.eup %2733  ;;  %2664 = vmatpush3.bf16.msra.mxu1 %v2661_v8 }
 0x452   :  { %2525 = vmatmul.mubr.msk.f32.vlgmr.msra.gmra.mrb[4].mxu0 %vm65_vm0, %v551_v10  ;;  %v250_v35 = vadd.f32 1.0, %v2734_v29  ;;  %v2736_v45 = vpop.eup %2735 }
 0x453   :  { %2529 = vmatprep.mubr.msk.f32.mxu0 %vm256_vm1, %v2973_v6  ;;  %2528 = vmatpush3.msra.mxu0 %v2959_v55  ;;  %v251_v59 = vadd.f32 1.0, %v2736_v45 }
 0x454   :  { %2532 = vmatprep.subr.mxu0 %v2986_v12  ;;  %2737 = vrcp.f32 %v250_v35 }
 0x455   :  { %2739 = vrcp.f32 %v251_v59 }
 0x456   :  { %2530 = vmatmul.mubr.msk.f32.vlgmr.msra.gmra.mrb[6].mxu0 %vm256_vm1, %v2979_v11 }
 0x457   :  { %2533 = vmatpush3.msra.mxu0 %v2986_v12 }
 0x458   :  { %2537 = vmatprep.subr.mxu0 %v2999_v15 }
 0x45e   :  { %v3051_v19 = vpop.eup %2737 }
 0x45f   :  { %v2740_v20 = vpop.eup %2739 }
 0x525   :  { %v2526_v13 = vpop.f32.mrb[4].mxu0 }
 0x526   :  { %642 = vrot.lane.b32.xlu1 %v2526_v13, %s2782_s20  ;;  %v629_v14 = vpop.f32.mrb[5].mxu0 }
 0x527   :  { %640 = vrot.lane.b32.xlu0 %v629_v14, %s2782_s20 }
 0x52a   :  { %1051 = vrot.lane.b32.xlu1 %v2973_v6, %s2781_s2 }
 0x52e   :  { %1053 = vrot.lane.b32.xlu1 %v2979_v11, %s2781_s2 }
 0x598   :  { %v643_v25 = vpop.permute.xlu1 %642 }
 0x599   :  { %v647_v26 = vsel %vm256_vm1, %v2948_v37, %v643_v25  ;;  %v641_v28 = vpop.permute.xlu0 %640  ;;  %v2665_v25 = vpack.c.bf16 %v721_v22, %v720_v21 }
 0x59a   :  { %v649_v30 = vadd.f32 %v647_v26, %v2888_v1  ;;  %v646_v31 = vsel %vm256_vm1, %v2950_v38, %v641_v28 }
 0x59b   :  { %v648_v32 = vadd.f32 %v646_v31, %v2883_v0  ;;  %2666 = vmatprep.subr.bf16.mxu1 %v2665_v25 }
 0x59c   :  { %v657_v33 = vrot.slane %v649_v30, %v656_v24  ;;  %v662_v34 = vrot.slane %v649_v30, 6  ;;  %2668 = vmatpush3.bf16.msra.mxu1 %v2665_v25  ;;  %v3069_v29 = vpop.permute.xlu1 %1051 }
 0x59d   :  { %v653_v36 = vrot.slane %v648_v32, %v652_v27  ;;  %v661_v37 = vrot.slane %v648_v32, 6  ;;  %2553 = vmatprep.subr.mxu1 %v2959_v55 }
 0x59e   :  { %v668_v39 = vsel %vm660_vm3, %v662_v34, %v657_v33 }
 0x59f   :  { %v675_v1 = vrot.slane %v668_v39, 1  ;;  %v685_v38 = vrot.slane %v668_v39, 2  ;;  %v663_v40 = vsel %vm660_vm3, %v661_v37, %v662_v34  ;;  %v667_v0 = vsel %vm660_vm3, %v653_v36, %v661_v37 }
 0x5a0   :  { %v672_v41 = vrot.slane %v667_v0, 1  ;;  %v673_v42 = vrot.slane %v663_v40, 1  ;;  %v682_v43 = vrot.slane %v667_v0, 2  ;;  %v683_v44 = vrot.slane %v663_v40, 2 }
 0x5a1   :  { %v692_v46 = vrot.slane %v667_v0, 3  ;;  %v693_v47 = vrot.slane %v663_v40, 3  ;;  %v702_v48 = vrot.slane %v667_v0, 4  ;;  %v703_v49 = vrot.slane %v663_v40, 4 }
 0x5a2   :  { %v674_v50 = vsel %vm671_vm4, %v672_v41, %v673_v42  ;;  %v684_v51 = vsel %vm681_vm5, %v682_v43, %v683_v44  ;;  %v676_v52 = vsel %vm671_vm4, %v673_v42, %v675_v1  ;;  %v686_v53 = vsel %vm681_vm5, %v683_v44, %v685_v38 }
 0x5a3   :  { %v679_v54 = vadd.f32 %v674_v50, %v667_v0  ;;  %v694_v56 = vsel %vm691_vm6, %v692_v46, %v693_v47  ;;  %v704_v57 = vsel %vm701_vm7, %v702_v48, %v703_v49  ;;  %v680_v58 = vadd.f32 %v676_v52, %v663_v40  ;;  %v1459_v40 = vld [vmem:[%s3218_s5] sm:$0xff] }
 0x5a4   :  { %v695_v60 = vrot.slane %v668_v39, 3  ;;  %v705_v61 = vrot.slane %v668_v39, 4 }
 0x5a5   :  { %v689_v62 = vadd.f32 %v684_v51, %v679_v54  ;;  %v690_v63 = vadd.f32 %v686_v53, %v680_v58 }
 0x5a6   :  { %v696_v4 = vsel %vm691_vm6, %v693_v47, %v695_v60  ;;  %v706_v5 = vsel %vm701_vm7, %v703_v49, %v705_v61 }
 0x5a7   :  { %v699_v9 = vadd.f32 %v694_v56, %v689_v62  ;;  %v700_v10 = vadd.f32 %v696_v4, %v690_v63 }
 0x5a9   :  { %v709_v7 = vadd.f32 %v704_v57, %v699_v9  ;;  %v710_v13 = vadd.f32 %v706_v5, %v700_v10  ;;  %v1654_v57 = vld [vmem:[%s3227_s14] sm:$0xff] }
 0x5ab   :  { %v711_v14 = vmul.f32 0.2, %v709_v7  ;;  %v712_v16 = vmul.f32 0.2, %v710_v13 }
 0x5ad   :  { %v3041_v17 = vsub.f32 %v648_v32, %v711_v14  ;;  %v3043_v18 = vsub.f32 %v649_v30, %v712_v16  ;;  %v3077_v32 = vpop.permute.xlu1 %1053  ;;  %v1653_v14 = vld [vmem:[%s3226_s13] sm:$0xff] }
 0x5af   :  { %1134 = vrot.lane.b32.xlu0 %v3041_v17, %s2781_s2  ;;  %1136 = vrot.lane.b32.xlu1 %v3043_v18, %s2781_s2 }
 0x5b0   :  { %2534 = vmatprep.mubr.msk.f32.mxu0 %vm256_vm1, %v3041_v17 }
 0x5b1   :  { %2535 = vmatmul.mubr.msk.f32.vlgmr.msra.gmra.mrb[6].mxu0 %vm256_vm1, %v3043_v18 }
 0x5b2   :  { %2538 = vmatpush3.msra.mxu0 %v2999_v15  ;;  %2539 = vmatprep.mubr.msk.f32.mxu0 %vm256_vm1, %v3051_v19 }
 0x5b3   :  { %1217 = vrot.lane.b32.xlu0 %v3051_v19, %s2781_s2  ;;  %1219 = vrot.lane.b32.xlu1 %v2740_v20, %s2781_s2 }
 0x5b4   :  { %2670 = vmatprep.subr.bf16.mxu0 %v2661_v8 }
 0x5b9   :  { %2540 = vmatmul.mubr.msk.f32.vlgmr.msra.gmra.mrb[6].mxu0 %vm256_vm1, %v2740_v20 }
 0x5ba   :  { %2672 = vmatpush3.bf16.msra.mxu0 %v2661_v8 }
 0x5bb   :  { %2674 = vmatprep.subr.bf16.mxu0 %v2665_v25 }
 0x5be   :  { %2676 = vmatpush3.bf16.msra.mxu0 %v2665_v25 }
 0x621   :  { %v1135_v33 = vpop.permute.xlu0 %1134  ;;  %v1137_v34 = vpop.permute.xlu1 %1136 }
 0x625   :  { %v1218_v35 = vpop.permute.xlu0 %1217 }
 0x68c   :  { %v2541_v26 = vpop.f32.mrb[6].mxu0 }
 0x68d   :  { %v956_v28 = vpop.f32.mrb[7].mxu0  ;;  %v968_v31 = vmax.f32 %v2541_v26, 0.0 }
 0x68e   :  { %v967_v30 = vmax.f32 %v956_v28, 0.0 }
 0x690   :  { %2550 = vmatprep.mubr.msk.f32.mxu1 %vm969_vm8, %v967_v30 }
 0x691   :  { %2551 = vmatmul.mubr.msk.f32.vlgmr.msra.gmra.mrb[6].mxu1 %vm969_vm8, %v968_v31 }
 0x692   :  { %2554 = vmatpush3.msra.mxu1 %v2959_v55  ;;  %2555 = vmatprep.mubr.msk.f32.mxu1 %vm256_vm1, %v3069_v29  ;;  %v1220_v55 = vpop.permute.xlu1 %1219 }
 0x693   :  { %2558 = vmatprep.subr.mxu1 %v2986_v12 }
 0x695   :  { %2556 = vmatmul.mubr.msk.f32.vlgmr.msra.gmra.mrb[8].mxu1 %vm256_vm1, %v3077_v32 }
 0x696   :  { %2559 = vmatpush3.msra.mxu1 %v2986_v12  ;;  %2560 = vmatprep.mubr.msk.f32.mxu1 %vm256_vm1, %v1135_v33 }
 0x697   :  { %2563 = vmatprep.subr.mxu1 %v2999_v15 }
 0x69d   :  { %2561 = vmatmul.mubr.msk.f32.vlgmr.msra.gmra.mrb[8].mxu1 %vm256_vm1, %v1137_v34 }
 0x69e   :  { %2564 = vmatpush3.msra.mxu1 %v2999_v15  ;;  %2565 = vmatprep.mubr.msk.f32.mxu1 %vm256_vm1, %v1218_v35  ;;  %v1556_v15 = vld [vmem:[%s3220_s7] sm:$0xff] }
 0x6a5   :  { %2566 = vmatmul.mubr.msk.f32.vlgmr.msra.gmra.mrb[8].mxu1 %vm256_vm1, %v1220_v55 }
 0x6a6   :  { %2590 = vmatprep.mubr.msk.f32.mxu1 %vm65_vm0, %v1556_v15 }
 0x764   :  { %v2552_v36 = vpop.f32.mrb[6].mxu1 }
 0x765   :  { %v1042_v37 = vpop.f32.mrb[7].mxu1 }
 0x778   :  { %v2567_v39 = vpop.f32.mrb[8].mxu1 }
 0x779   :  { %v1291_v1 = vpop.f32.mrb[9].mxu1  ;;  %v1303_v38 = vmax.f32 %v2567_v39, 0.0  ;;  %v1462_v39 = vld [vmem:[%s3219_s6 + $0x8] sm:$0xff] }
 0x77a   :  { %v1302_v12 = vmax.f32 %v1291_v1, 0.0  ;;  %v1559_v1 = vld [vmem:[%s3221_s8 + $0x8] sm:$0xff] }
 0x77c   :  { %2576 = vmatprep.mubr.msk.f32.mxu0 %vm969_vm8, %v1302_v12  ;;  %v1461_v12 = vld [vmem:[%s3219_s6] sm:$0xff]  ;;  %s2783_s6 = smov [#allocation2]  }
 0x77d   :  { %2577 = vmatmul.mubr.msk.f32.vlgmr.msra.gmra.mrb[8].mxu0 %vm969_vm8, %v1303_v38  ;;  %v1558_v38 = vld [vmem:[%s3221_s8] sm:$0xff]  ;;  %s2326_s8 = sshll.u32 %s2783_s6, 4  ;;  %s2327_s8 = int_to_ptr.vmem [resolvable:$true] %s2326_s8 }
 0x77e   :  { %2583 = vmatprep.mubr.msk.f32.mxu0 %vm65_vm0, %v1459_v40  ;;  %p2762_p1 = scmp.lt.s32.totalorder %s2327_s8, %s2327_s8 }
 0x850   :  { %v2578_v0 = vpop.f32.mrb[8].mxu0 }
 0x851   :  { %1389 = vrot.lane.b32.xlu1 %v2578_v0, %s2782_s20  ;;  %v1376_v41 = vpop.f32.mrb[9].mxu0 }
 0x852   :  { %1387 = vrot.lane.b32.xlu0 %v1376_v41, %s2782_s20 }
 0x8c3   :  { %v1390_v42 = vpop.permute.xlu1 %1389 }
 0x8c4   :  { %v1394_v43 = vsel %vm256_vm1, %v2552_v36, %v1390_v42  ;;  %v1388_v44 = vpop.permute.xlu0 %1387 }
 0x8c5   :  { %v3102_v45 = vadd.f32 %v1394_v43, %v3043_v18  ;;  %v1458_v46 = vadd.f32 %v2740_v20, %v1394_v43  ;;  %v1393_v47 = vsel %vm256_vm1, %v1042_v37, %v1388_v44 }
 0x8c6   :  { %v3106_v48 = vadd.f32 %v1393_v47, %v3041_v17  ;;  %v1457_v49 = vadd.f32 %v3051_v19, %v1393_v47 }
 0x8c7   :  { %v1404_v50 = vrot.slane %v3102_v45, %v656_v24  ;;  %v1408_v51 = vrot.slane %v3102_v45, 6 }
 0x8c8   :  { %v1400_v52 = vrot.slane %v3106_v48, %v652_v27  ;;  %v1407_v53 = vrot.slane %v3106_v48, 6  ;;  %v2677_v54 = vpack.c.bf16 %v1458_v46, %v1457_v49  ;;  %v1557_v27 = vld [vmem:[%s3220_s7 + $0x8] sm:$0xff] }
 0x8c9   :  { %v1414_v56 = vsel %vm660_vm3, %v1408_v51, %v1404_v50 }
 0x8ca   :  { %v1420_v58 = vrot.slane %v1414_v56, 1  ;;  %v1429_v59 = vrot.slane %v1414_v56, 2  ;;  %v1409_v60 = vsel %vm660_vm3, %v1407_v53, %v1408_v51  ;;  %v1413_v24 = vsel %vm660_vm3, %v1400_v52, %v1407_v53  ;;  %2678 = vmatprep.subr.bf16.mxu0 %v2677_v54  ;;  %2682 = vmatprep.subr.bf16.mxu1 %v2677_v54 }
 0x8cb   :  { %2680 = vmatpush3.bf16.msra.mxu0 %v2677_v54  ;;  %2684 = vmatpush3.bf16.msra.mxu1 %v2677_v54  ;;  %v1418_v61 = vrot.slane %v1409_v60, 1  ;;  %v1427_v62 = vrot.slane %v1409_v60, 2  ;;  %v1436_v63 = vrot.slane %v1409_v60, 3  ;;  %v1438_v2 = vrot.slane %v1414_v56, 3 }
 0x8cc   :  { %2593 = vmatprep.subr.mxu0 %v1654_v57  ;;  %2613 = vmatprep.subr.mxu1 %v1654_v57  ;;  %v1445_v3 = vrot.slane %v1409_v60, 4  ;;  %v1447_v4 = vrot.slane %v1414_v56, 4  ;;  %v1417_v5 = vrot.slane %v1413_v24, 1  ;;  %v1426_v8 = vrot.slane %v1413_v24, 2 }
 0x8cd   :  { %v1421_v9 = vsel %vm671_vm4, %v1418_v61, %v1420_v58  ;;  %v1430_v10 = vsel %vm681_vm5, %v1427_v62, %v1429_v59  ;;  %v1439_v7 = vsel %vm691_vm6, %v1436_v63, %v1438_v2  ;;  %v1435_v13 = vrot.slane %v1413_v24, 3 }
 0x8ce   :  { %2584 = vmatmul.mubr.msk.f32.vlgmr.msra.gmra.mrb[10].mxu0 %vm65_vm0, %v1460_v23  ;;  %2591 = vmatmul.mubr.msk.f32.vlgmr.msra.gmra.mrb[10].mxu1 %vm65_vm0, %v1557_v27  ;;  %v1425_v16 = vadd.f32 %v1421_v9, %v1409_v60  ;;  %v1448_v17 = vsel %vm701_vm7, %v1445_v3, %v1447_v4  ;;  %v1419_v18 = vsel %vm671_vm4, %v1417_v5, %v1418_v61  ;;  %v1444_v19 = vrot.slane %v1413_v24, 4 }
 0x8cf   :  { %2595 = vmatprep.mubr.msk.f32.mxu0 %vm256_vm1, %v2973_v6  ;;  %2615 = vmatprep.mubr.msk.f32.mxu1 %vm256_vm1, %v3069_v29  ;;  %v1424_v20 = vadd.f32 %v1419_v18, %v1413_v24  ;;  %v1428_v21 = vsel %vm681_vm5, %v1426_v8, %v1427_v62  ;;  %v1437_v22 = vsel %vm691_vm6, %v1435_v13, %v1436_v63 }
 0x8d0   :  { %2594 = vmatpush3.msra.mxu0 %v1654_v57  ;;  %2614 = vmatpush3.msra.mxu1 %v1654_v57  ;;  %v1434_v25 = vadd.f32 %v1430_v10, %v1425_v16  ;;  %v1446_v26 = vsel %vm701_vm7, %v1444_v19, %v1445_v3 }
 0x8d1   :  { %2598 = vmatprep.subr.mxu0 %v1653_v14  ;;  %v1433_v28 = vadd.f32 %v1428_v21, %v1424_v20  ;;  %2618 = vmatprep.subr.mxu1 %v1653_v14 }
 0x8d2   :  { %2596 = vmatmul.mubr.msk.f32.vlgmr.msra.gmra.mrb[12].mxu0 %vm256_vm1, %v2979_v11  ;;  %2616 = vmatmul.mubr.msk.f32.vlgmr.msra.gmra.mrb[12].mxu1 %vm256_vm1, %v3077_v32  ;;  %v1443_v6 = vadd.f32 %v1439_v7, %v1434_v25  ;;  %v1655_v11 = vld [vmem:[%s3228_s15] sm:$0xff] }
 0x8d3   :  { %2599 = vmatpush3.msra.mxu0 %v1653_v14  ;;  %v1442_v29 = vadd.f32 %v1437_v22, %v1433_v28  ;;  %2619 = vmatpush3.msra.mxu1 %v1653_v14  ;;  %v1656_v32 = vld [vmem:[%s3229_s16] sm:$0xff] }
 0x8d4   :  { %v1452_v30 = vadd.f32 %v1448_v17, %v1443_v6  ;;  %2603 = vmatprep.subr.mxu0 %v1655_v11  ;;  %2623 = vmatprep.subr.mxu1 %v1655_v11 }
 0x8d5   :  { %v1451_v31 = vadd.f32 %v1446_v26, %v1442_v29 }
 0x8d6   :  { %v1454_v33 = vmul.f32 0.2, %v1452_v30 }
 0x8d7   :  { %v1453_v34 = vmul.f32 0.2, %v1451_v31 }
 0x8d8   :  { %v1456_v35 = vsub.f32 %v3102_v45, %v1454_v33 }
 0x8d9   :  { %v1455_v55 = vsub.f32 %v3106_v48, %v1453_v34 }
 0x8da   :  { %2056 = vrot.lane.b32.xlu1 %v1456_v35, %s2781_s2 }
 0x8db   :  { %2054 = vrot.lane.b32.xlu0 %v1455_v55, %s2781_s2  ;;  %2600 = vmatprep.mubr.msk.f32.mxu0 %vm256_vm1, %v1455_v55 }
 0x8dc   :  { %2601 = vmatmul.mubr.msk.f32.vlgmr.msra.gmra.mrb[12].mxu0 %vm256_vm1, %v1456_v35 }
 0x8dd   :  { %2604 = vmatpush3.msra.mxu0 %v1655_v11 }
 0x8de   :  { %2608 = vmatprep.subr.mxu0 %v1656_v32 }
 0x94c   :  { %v2057_v36 = vpop.permute.xlu1 %2056 }
 0x94d   :  { %v2055_v37 = vpop.permute.xlu0 %2054 }
 0x94e   :  { %2620 = vmatprep.mubr.msk.f32.mxu1 %vm256_vm1, %v2055_v37 }
 0x94f   :  { %2621 = vmatmul.mubr.msk.f32.vlgmr.msra.gmra.mrb[12].mxu1 %vm256_vm1, %v2057_v36 }
 0x950   :  { %2624 = vmatpush3.msra.mxu1 %v1655_v11 }
 0x951   :  { %2628 = vmatprep.subr.mxu1 %v1656_v32 }
 0x9a1   :  { %v2585_v40 = vpop.f32.mrb[10].mxu0  ;;  %v2592_v15 = vpop.f32.mrb[10].mxu1 }
 0x9a2   :  { %v1541_v0 = vadd.f32 %v2585_v40, %v1462_v39  ;;  %v1535_v41 = vpop.f32.mrb[11].mxu0  ;;  %v1638_v42 = vadd.f32 %v2592_v15, %v1559_v1  ;;  %v1632_v43 = vpop.f32.mrb[11].mxu1 }
 0x9a3   :  { %v1536_v44 = vadd.f32 %v1535_v41, %v1461_v12  ;;  %v1633_v45 = vadd.f32 %v1632_v43, %v1558_v38 }
 0x9a4   :  { %v2378_v46 = vmul.f32 -1.442695, %v1541_v0  ;;  %v2382_v47 = vmul.f32 -1.442695, %v1638_v42 }
 0x9a5   :  { %v2377_v48 = vmul.f32 -1.442695, %v1536_v44  ;;  %v2381_v49 = vmul.f32 -1.442695, %v1633_v45 }
 0x9a6   :  { %2741 = vpow2.f32 %v2378_v46 }
 0x9a7   :  { %2743 = vpow2.f32 %v2377_v48 }
 0x9a8   :  { %2745 = vpow2.f32 %v2382_v47 }
 0x9a9   :  { %2747 = vpow2.f32 %v2381_v49 }
 0x9b0   :  { %v2742_v50 = vpop.eup %2741 }
 0x9b1   :  { %v2744_v51 = vpop.eup %2743  ;;  %v1551_v52 = vadd.f32 1.0, %v2742_v50 }
 0x9b2   :  { %v2746_v53 = vpop.eup %2745  ;;  %v1550_v54 = vadd.f32 1.0, %v2744_v51 }
 0x9b3   :  { %v2748_v56 = vpop.eup %2747  ;;  %2749 = vrcp.f32 %v1551_v52  ;;  %v1648_v57 = vadd.f32 1.0, %v2746_v53 }
 0x9b4   :  { %2751 = vrcp.f32 %v1550_v54  ;;  %v1647_v58 = vadd.f32 1.0, %v2748_v56 }
 0x9b5   :  { %2753 = vrcp.f32 %v1648_v57 }
 0x9b6   :  { %2755 = vrcp.f32 %v1647_v58 }
 0x9bd   :  { %v2750_v59 = vpop.eup %2749 }
 0x9be   :  { %v2752_v60 = vpop.eup %2751  ;;  %2139 = vrot.lane.b32.xlu1 %v2750_v59, %s2781_s2 }
 0x9bf   :  { %v2754_v24 = vpop.eup %2753  ;;  %2137 = vrot.lane.b32.xlu0 %v2752_v60, %s2781_s2  ;;  %2605 = vmatprep.mubr.msk.f32.mxu0 %vm256_vm1, %v2752_v60 }
 0x9c0   :  { %v2756_v23 = vpop.eup %2755  ;;  %2606 = vmatmul.mubr.msk.f32.vlgmr.msra.gmra.mrb[12].mxu0 %vm256_vm1, %v2750_v59 }
 0x9c1   :  { %2609 = vmatpush3.msra.mxu0 %v1656_v32  ;;  %2610 = vmatprep.mubr.msk.f32.mxu0 %vm256_vm1, %v2756_v23 }
 0x9c2   :  { %2224 = vrot.lane.b32.xlu1 %v2754_v24, %s2781_s2 }
 0x9c3   :  { %2222 = vrot.lane.b32.xlu0 %v2756_v23, %s2781_s2  ;;  %s2757_s2 = scalar_lea.vmem %s2327_s8, 512 }
 0x9c4   :  { %p2758_p0 = scmp.ne.s32.totalorder %s2327_s8, %s2757_s2  ;;  %p2763_p2 = scmp.lt.s32.totalorder %s2757_s2, %s2757_s2 }
 0x9c6   :  { %p2764_p3 = por %p2763_p2, %p2762_p1 }
 0x9c8   :  { %2611 = vmatmul.mubr.msk.f32.vlgmr.msra.gmra.mrb[12].mxu0 %vm256_vm1, %v2754_v24  ;;  %p2765_p4 = pnand %p2764_p3, %p2758_p0 }
 0xa30   :  { %v2140_v61 = vpop.permute.xlu1 %2139 }
 0xa31   :  { %v2138_v27 = vpop.permute.xlu0 %2137 }
 0xa32   :  { %2625 = vmatprep.mubr.msk.f32.mxu1 %vm256_vm1, %v2138_v27 }
 0xa33   :  { %2626 = vmatmul.mubr.msk.f32.vlgmr.msra.gmra.mrb[12].mxu1 %vm256_vm1, %v2140_v61 }
 0xa34   :  { %2629 = vmatpush3.msra.mxu1 %v1656_v32  ;;  %v2225_v63 = vpop.permute.xlu1 %2224 }
 0xa35   :  { %v2223_v62 = vpop.permute.xlu0 %2222 }
 0xa36   :  { %2630 = vmatprep.mubr.msk.f32.mxu1 %vm256_vm1, %v2223_v62 }
 0xa3b   :  { %2631 = vmatmul.mubr.msk.f32.vlgmr.msra.gmra.mrb[12].mxu1 %vm256_vm1, %v2225_v63 }
 0xa9b   :  { %v2612_v2 = vpop.f32.mrb[12].mxu0 }
 0xa9c   :  { %v1968_v3 = vpop.f32.mrb[13].mxu0 }
 0xa9d   :  { %2768 = shalt.err (!%p2765_p4)
}
 0xa9e   :  { %s2769_s0 = scalar_lea.hbm %s3231_s18, 512 }
 0xa9f   :  { %p2770_p5 = scmp.ne.s32.totalorder %s3231_s18, %s2769_s0  ;;  %p2773_p6 = scmp.lt.u32.totalorder %s2769_s0, %s3231_s18 }
 0xaa1   :  { %p2775_p7 = pnand %p2773_p6, %p2770_p5 }
 0xaa3   :  { %2778 = shalt.err (!%p2775_p7)
}
 0xaa4   :  { %s2784_s9 = smov 128  }
 0xaa5   :  { %2332 = dma.vmem_to_hbm [thread:$0]  %s2327_s8, 512, %s3231_s18, [#allocation3], %s2784_s9, %s2784_s9, %s2782_s20  }
 0xb0e   :  { %v2632_v4 = vpop.f32.mrb[12].mxu1 }
 0xb0f   :  { %2311 = vrot.lane.b32.xlu1 %v2632_v4, %s2782_s20  ;;  %v2296_v5 = vpop.f32.mrb[13].mxu1 }
 0xb10   :  { %2309 = vrot.lane.b32.xlu0 %v2296_v5, %s2782_s20 }
 0xb81   :  { %v2312_v8 = vpop.permute.xlu1 %2311 }
 0xb82   :  { %v2316_v9 = vsel %vm256_vm1, %v2612_v2, %v2312_v8  ;;  %v2310_v10 = vpop.permute.xlu0 %2309 }
 0xb83   :  { %2318 = vst.msk [vmem:[%s3230_s17 + $0x8] sm:$0xff] %vm65_vm0, %v2316_v9  ;;  %v2315_v7 = vsel %vm256_vm1, %v1968_v3, %v2310_v10 }
 0xb84   :  { %2317 = vst.msk [vmem:[%s3230_s17] sm:$0xff] %vm65_vm0, %v2315_v7 }
 0xb85   :  { %2779 = dma.done.wait [#allocation3], 512  }
 0xb86   :  { %2780 = vsyncadd [#allocation3], 4294966784 }
 0xb87   :  { %2338 = vsyncpa [#allocation3], 1 }

</bundles_post_ra>
